<compile_context>
chip_gen: v5e
topology: v5e:2x2
jax: 0.10.0
libtpu: 0.0.40
codegen_flags: <defaults>
</compile_context>

<pallas_src>
import jax
import jax.numpy as jnp
from jax.experimental import pallas as pl
from jax.experimental.pallas import tpu as pltpu


def _noiseclas_kernel(x_ref, mask_ref, labels_ref,
                      we_ref, be_ref, wh_ref, bh_ref,
                      out_ref):
    """One batch block (BB rows) per grid step; the batch axis is 'parallel'."""
    bb, t, d = x_ref.shape
    e = we_ref.shape[1]

    # --- Embedder: one batched per-timestep linear projection on the MXU ---
    # x is bf16 transport; accumulate in f32.
    x2 = x_ref[...].reshape(bb * t, d)                                 # (BB*T, D) bf16
    emb = jnp.dot(x2, we_ref[...],
                  preferred_element_type=jnp.float32) + be_ref[...]    # (BB*T, E) f32
    emb = emb.reshape(bb, t, e)                                        # (BB, T, E)

    # --- NoiseLinearHead: masked mean-pool over time ---
    # VPU multiply + sublane (XLU) reduce; overlaps with the next block's
    # embed matmul instead of serializing through an M=1 MXU matmul.
    m = mask_ref[...]                                                  # (BB, T, 1) f32
    summed = jnp.sum(emb * m, axis=1)                                  # (BB, E)
    lengths = jnp.sum(m, axis=1)                                       # (BB, 1)
    # NOTE: matches the module semantics (an all-zero mask row divides by 0).
    pooled = summed / lengths                                          # (BB, E)

    # --- Head linear: (BB, E) x (E, C) on the MXU, f32 accumulation ---
    logits = jnp.dot(pooled.astype(jnp.bfloat16), wh_ref[...],
                     preferred_element_type=jnp.float32) + bh_ref[...]  # (BB, C)

    # --- BCEWithLogitsLoss per-element terms (mean taken in the wrapper) ---
    y = labels_ref[:, 0, :]                                            # (BB, C)
    per = (jnp.maximum(logits, 0.0) - logits * y
           + jnp.log1p(jnp.exp(-jnp.abs(logits))))                     # (BB, C)

    # Single merged output block -> one writeback DMA per grid step.
    out_ref[:, 0, :] = logits
    out_ref[:, 1, :] = per


def _choose_block_b(B, T, D, E):
    """Largest batch block that (a) divides B, (b) fits a conservative VMEM
    budget with double buffering, (c) leaves >= 2 grid steps when possible."""
    # Per batch row: double-buffered bf16 x block + f32 emb intermediate.
    bytes_per_row = 2 * (2 * T * D) + 4 * T * E
    budget = 6 << 20          # conservative vs v5e 16 MiB / v7x 32 MiB scoped VMEM
    bb = max(1, min(B, budget // max(bytes_per_row, 1)))
    if bb >= B and B > 1:     # keep >= 2 grid steps (feeds both v7x TCs)
        bb = max(1, B // 2)
    while B % bb:             # avoid ragged tails
        bb -= 1
    return bb


def noise_classifier_forward(x, labels, attention_mask, we, be, wh, bh,
                             *, block_b=None):
    """x: (B, T, D_in), labels: (B, C), attention_mask: (B, T)."""
    B, T, D = x.shape
    E = we.shape[1]
    C = wh.shape[1]

    if block_b is None:
        block_b = _choose_block_b(B, T, D, E)
    assert B % block_b == 0, "batch block must divide B"
    grid_b = B // block_b

    # bf16 transport for the HBM-dominant operand and the resident weights;
    # cast once here instead of re-casting on the VPU every grid step.
    x_bf16 = x.astype(jnp.bfloat16)
    we_bf16 = we.astype(jnp.bfloat16)
    wh_bf16 = wh.astype(jnp.bfloat16)

    # Free metadata reshapes so every block's last two dims equal the full
    # array dims (satisfies the (8,128) tiling rule for any block_b).
    mask3 = attention_mask.astype(jnp.float32).reshape(B, T, 1)
    labels3 = labels.astype(jnp.float32).reshape(B, 1, C)

    cost = pl.CostEstimate(
        flops=B * (2 * T * D * E + 3 * T * E + 2 * E * C + 6 * C),
        transcendentals=2 * B * C,
        bytes_accessed=(2 * B * T * D            # x (bf16)
                        + 4 * B * T              # mask (f32)
                        + 4 * B * C              # labels (f32)
                        + 2 * (D * E + E * C)    # bf16 weights (resident)
                        + 4 * (E + C)            # f32 biases
                        + 4 * B * 2 * C),        # merged output (f32)
    )

    out = pl.pallas_call(
        _noiseclas_kernel,
        grid=(grid_b,),
        in_specs=[
            pl.BlockSpec((block_b, T, D), lambda i: (i, 0, 0)),   # x (bf16)
            pl.BlockSpec((block_b, T, 1), lambda i: (i, 0, 0)),   # attention mask
            pl.BlockSpec((block_b, 1, C), lambda i: (i, 0, 0)),   # labels
            pl.BlockSpec((D, E), lambda i: (0, 0)),               # embed weight (resident)
            pl.BlockSpec((1, E), lambda i: (0, 0)),               # embed bias
            pl.BlockSpec((E, C), lambda i: (0, 0)),               # head weight (resident)
            pl.BlockSpec((1, C), lambda i: (0, 0)),               # head bias
        ],
        out_specs=pl.BlockSpec((block_b, 2, C), lambda i: (i, 0, 0)),
        out_shape=jax.ShapeDtypeStruct((B, 2, C), jnp.float32),
        compiler_params=pltpu.CompilerParams(
            dimension_semantics=("parallel",)),
        cost_estimate=cost,
    )(x_bf16, mask3, labels3, we_bf16, be, wh_bf16, bh)

    preds = out[:, 0, :]                     # (B, C) logits
    # Scalar mean of ~B*C terms: a dedicated kernel launch is pure overhead,
    # let XLA reduce it.
    loss = jnp.mean(out[:, 1, :])

    return {"loss": loss, "predictions": preds, "labels": labels}


def _reference(x, labels, attention_mask, we, be, wh, bh):
    """Pure-JAX (f32) mirror of the PyTorch forward (correctness check)."""
    emb = jnp.einsum("btd,de->bte", x, we) + be[0]                 # embedder
    lengths = attention_mask.sum(axis=1)                           # (B,)
    out = (attention_mask[:, :, None] * emb).sum(axis=1)           # (B, E)
    out = out / lengths[:, None]
    logits = out @ wh + bh[0]                                      # (B, C)
    per = (jnp.maximum(logits, 0.0) - logits * labels
           + jnp.log1p(jnp.exp(-jnp.abs(logits))))
    return jnp.mean(per), logits


if __name__ == "__main__":
    B, T, D_IN, EMB, NUM_CL = 2, 8, 16, 32, 4

    key = jax.random.PRNGKey(0)
    kx, kl, kwe, kbe, kwh, kbh = jax.random.split(key, 6)

    x = jax.random.normal(kx, (B, T, D_IN), dtype=jnp.float32)
    labels = jax.random.bernoulli(kl, 0.5, (B, NUM_CL)).astype(jnp.float32)

    # attention mask: batch 0 -> full length T, batch 1 -> length 5
    lengths = jnp.array([T, 5], dtype=jnp.int32)
    attention_mask = (jnp.arange(T)[None, :] < lengths[:, None]).astype(jnp.float32)

    # deterministic synthetic parameters (shapes from module __init__)
    we = 0.1 * jax.random.normal(kwe, (D_IN, EMB), dtype=jnp.float32)
    be = 0.1 * jax.random.normal(kbe, (1, EMB), dtype=jnp.float32)
    wh = 0.1 * jax.random.normal(kwh, (EMB, NUM_CL), dtype=jnp.float32)
    bh = 0.1 * jax.random.normal(kbh, (1, NUM_CL), dtype=jnp.float32)

    out = noise_classifier_forward(x, labels, attention_mask, we, be, wh, bh)
    jax.block_until_ready(out["loss"])
    jax.block_until_ready(out["predictions"])

    ref_loss, ref_logits = _reference(x, labels, attention_mask, we, be, wh, bh)
    # bf16 transport of x and bf16 MXU weights vs the f32 reference: ~1e-3
    # level deviation expected, so use a 2e-2 tolerance.
    assert jnp.allclose(out["predictions"], ref_logits, atol=2e-2, rtol=2e-2)
    assert jnp.allclose(out["loss"], ref_loss, atol=2e-2, rtol=2e-2)

    print("KERNEL_OK")
</pallas_src>

<mosaic_0001>
module attributes {stable_mosaic.version = 11 : i64} {
  func.func @_noiseclas_kernel(%arg0: i32, %arg1: memref<1x8x16xbf16, #tpu.memory_space<vmem>>, %arg2: memref<1x8x1xf32, #tpu.memory_space<vmem>>, %arg3: memref<1x1x4xf32, #tpu.memory_space<vmem>>, %arg4: memref<16x32xbf16, #tpu.memory_space<vmem>>, %arg5: memref<1x32xf32, #tpu.memory_space<vmem>>, %arg6: memref<32x4xbf16, #tpu.memory_space<vmem>>, %arg7: memref<1x4xf32, #tpu.memory_space<vmem>>, %arg8: memref<1x2x4xf32, #tpu.memory_space<vmem>>) attributes {dimension_semantics = [#tpu.dimension_semantics<parallel>], iteration_bounds = array<i64: 2>, scalar_prefetch = 0 : i64, scratch_operands = 0 : i64, tpu.core_type = #tpu.core_type<tc>, window_params = [{transform_indices = @transform_0, window_bounds = array<i64: 1, 8, 16>}, {transform_indices = @transform_1, window_bounds = array<i64: 1, 8, 1>}, {transform_indices = @transform_2, window_bounds = array<i64: 1, 1, 4>}, {pipeline_mode = #tpu.pipeline_mode<synchronous>, transform_indices = @transform_3, window_bounds = array<i64: 16, 32>}, {pipeline_mode = #tpu.pipeline_mode<synchronous>, transform_indices = @transform_4, window_bounds = array<i64: 1, 32>}, {pipeline_mode = #tpu.pipeline_mode<synchronous>, transform_indices = @transform_5, window_bounds = array<i64: 32, 4>}, {pipeline_mode = #tpu.pipeline_mode<synchronous>, transform_indices = @transform_6, window_bounds = array<i64: 1, 4>}, {transform_indices = @transform_7, window_bounds = array<i64: 1, 2, 4>}]} {
    %c0 = arith.constant 0 : index
    %c0_0 = arith.constant 0 : index
    %c0_1 = arith.constant 0 : index
    %0 = vector.load %arg1[%c0, %c0_0, %c0_1] : memref<1x8x16xbf16, #tpu.memory_space<vmem>>, vector<1x8x16xbf16>
    %1 = vector.shape_cast %0 : vector<1x8x16xbf16> to vector<8x16xbf16>
    %c0_2 = arith.constant 0 : index
    %c0_3 = arith.constant 0 : index
    %2 = vector.load %arg4[%c0_2, %c0_3] : memref<16x32xbf16, #tpu.memory_space<vmem>>, vector<16x32xbf16>
    %cst = arith.constant dense<0.000000e+00> : vector<8x32xf32>
    %3 = tpu.matmul %1, %2, %cst {dimension_numbers = #tpu.dot_dimension_numbers<[1], [0], [0], [1], [0, 0, 1, 1], [], []>} : vector<8x16xbf16>, vector<16x32xbf16>, vector<8x32xf32> -> vector<8x32xf32>
    %c0_4 = arith.constant 0 : index
    %c0_5 = arith.constant 0 : index
    %4 = vector.load %arg5[%c0_4, %c0_5] : memref<1x32xf32, #tpu.memory_space<vmem>>, vector<1x32xf32>
    %5 = vector.broadcast %4 : vector<1x32xf32> to vector<8x32xf32>
    %6 = arith.addf %3, %5 : vector<8x32xf32>
    %7 = vector.shape_cast %6 : vector<8x32xf32> to vector<1x8x32xf32>
    %c0_6 = arith.constant 0 : index
    %c0_7 = arith.constant 0 : index
    %c0_8 = arith.constant 0 : index
    %8 = vector.load %arg2[%c0_6, %c0_7, %c0_8] : memref<1x8x1xf32, #tpu.memory_space<vmem>>, vector<1x8x1xf32>
    %9 = vector.broadcast %8 : vector<1x8x1xf32> to vector<1x8x32xf32>
    %10 = arith.mulf %7, %9 : vector<1x8x32xf32>
    %cst_9 = arith.constant dense<0.000000e+00> : vector<1x32xf32>
    %11 = vector.multi_reduction <add>, %10, %cst_9 [1] : vector<1x8x32xf32> to vector<1x32xf32>
    %cst_10 = arith.constant dense<0.000000e+00> : vector<1x1xf32>
    %12 = vector.multi_reduction <add>, %8, %cst_10 [1] : vector<1x8x1xf32> to vector<1x1xf32>
    %13 = vector.broadcast %12 : vector<1x1xf32> to vector<1x32xf32>
    %14 = arith.divf %11, %13 : vector<1x32xf32>
    %15 = arith.truncf %14 : vector<1x32xf32> to vector<1x32xbf16>
    %c0_11 = arith.constant 0 : index
    %c0_12 = arith.constant 0 : index
    %16 = vector.load %arg6[%c0_11, %c0_12] : memref<32x4xbf16, #tpu.memory_space<vmem>>, vector<32x4xbf16>
    %cst_13 = arith.constant dense<0.000000e+00> : vector<1x4xf32>
    %17 = tpu.matmul %15, %16, %cst_13 {dimension_numbers = #tpu.dot_dimension_numbers<[1], [0], [0], [1], [0, 0, 1, 1], [], []>} : vector<1x32xbf16>, vector<32x4xbf16>, vector<1x4xf32> -> vector<1x4xf32>
    %c0_14 = arith.constant 0 : index
    %c0_15 = arith.constant 0 : index
    %18 = vector.load %arg7[%c0_14, %c0_15] : memref<1x4xf32, #tpu.memory_space<vmem>>, vector<1x4xf32>
    %19 = arith.addf %17, %18 : vector<1x4xf32>
    %c0_16 = arith.constant 0 : index
    %c0_17 = arith.constant 0 : index
    %c0_18 = arith.constant 0 : index
    %20 = vector.load %arg3[%c0_16, %c0_17, %c0_18] : memref<1x1x4xf32, #tpu.memory_space<vmem>>, vector<1x1x4xf32>
    %21 = vector.shape_cast %20 : vector<1x1x4xf32> to vector<1x4xf32>
    %cst_19 = arith.constant 0.000000e+00 : f32
    %22 = vector.broadcast %cst_19 : f32 to vector<1x4xf32>
    %23 = arith.maximumf %19, %22 : vector<1x4xf32>
    %24 = arith.mulf %19, %21 : vector<1x4xf32>
    %25 = arith.subf %23, %24 : vector<1x4xf32>
    %26 = math.absf %19 : vector<1x4xf32>
    %cst_20 = arith.constant 0.000000e+00 : f32
    %27 = vector.broadcast %cst_20 : f32 to vector<1x4xf32>
    %28 = arith.subf %27, %26 : vector<1x4xf32>
    %29 = math.exp %28 : vector<1x4xf32>
    %30 = math.log1p %29 : vector<1x4xf32>
    %31 = arith.addf %25, %30 : vector<1x4xf32>
    %c0_21 = arith.constant 0 : index
    %c0_22 = arith.constant 0 : index
    %c0_23 = arith.constant 0 : index
    %32 = vector.load %arg8[%c0_21, %c0_22, %c0_23] : memref<1x2x4xf32, #tpu.memory_space<vmem>>, vector<1x1x4xf32>
    %33 = vector.shape_cast %32 : vector<1x1x4xf32> to vector<1x4xf32>
    %34 = vector.shape_cast %19 : vector<1x4xf32> to vector<1x1x4xf32>
    tpu.vector_store %arg8[%c0_21, %c0_22, %c0_23], %34 {strides = array<i32>} : memref<1x2x4xf32, #tpu.memory_space<vmem>>, vector<1x1x4xf32>,
    %c0_24 = arith.constant 0 : index
    %c1 = arith.constant 1 : index
    %c0_25 = arith.constant 0 : index
    %35 = vector.load %arg8[%c0_24, %c1, %c0_25] : memref<1x2x4xf32, #tpu.memory_space<vmem>>, vector<1x1x4xf32>
    %36 = vector.shape_cast %35 : vector<1x1x4xf32> to vector<1x4xf32>
    %37 = vector.shape_cast %31 : vector<1x4xf32> to vector<1x1x4xf32>
    tpu.vector_store %arg8[%c0_24, %c1, %c0_25], %37 {strides = array<i32>} : memref<1x2x4xf32, #tpu.memory_space<vmem>>, vector<1x1x4xf32>,
    return
  }
  func.func @transform_0(%arg0: i32) -> (i32, i32, i32) {
    %c0_i32 = arith.constant 0 : i32
    %c0_i32_0 = arith.constant 0 : i32
    %c0_i32_1 = arith.constant 0 : i32
    return %arg0, %c0_i32, %c0_i32_0 : i32, i32, i32
  }
  func.func @transform_1(%arg0: i32) -> (i32, i32, i32) {
    %c0_i32 = arith.constant 0 : i32
    %c0_i32_0 = arith.constant 0 : i32
    %c0_i32_1 = arith.constant 0 : i32
    return %arg0, %c0_i32, %c0_i32_0 : i32, i32, i32
  }
  func.func @transform_2(%arg0: i32) -> (i32, i32, i32) {
    %c0_i32 = arith.constant 0 : i32
    %c0_i32_0 = arith.constant 0 : i32
    %c0_i32_1 = arith.constant 0 : i32
    return %arg0, %c0_i32, %c0_i32_0 : i32, i32, i32
  }
  func.func @transform_3(%arg0: i32) -> (i32, i32) {
    %c0_i32 = arith.constant 0 : i32
    %c0_i32_0 = arith.constant 0 : i32
    %c0_i32_1 = arith.constant 0 : i32
    return %c0_i32, %c0_i32_0 : i32, i32
  }
  func.func @transform_4(%arg0: i32) -> (i32, i32) {
    %c0_i32 = arith.constant 0 : i32
    %c0_i32_0 = arith.constant 0 : i32
    %c0_i32_1 = arith.constant 0 : i32
    return %c0_i32, %c0_i32_0 : i32, i32
  }
  func.func @transform_5(%arg0: i32) -> (i32, i32) {
    %c0_i32 = arith.constant 0 : i32
    %c0_i32_0 = arith.constant 0 : i32
    %c0_i32_1 = arith.constant 0 : i32
    return %c0_i32, %c0_i32_0 : i32, i32
  }
  func.func @transform_6(%arg0: i32) -> (i32, i32) {
    %c0_i32 = arith.constant 0 : i32
    %c0_i32_0 = arith.constant 0 : i32
    %c0_i32_1 = arith.constant 0 : i32
    return %c0_i32, %c0_i32_0 : i32, i32
  }
  func.func @transform_7(%arg0: i32) -> (i32, i32, i32) {
    %c0_i32 = arith.constant 0 : i32
    %c0_i32_0 = arith.constant 0 : i32
    %c0_i32_1 = arith.constant 0 : i32
    return %arg0, %c0_i32, %c0_i32_0 : i32, i32, i32
  }
}

</mosaic_0001>

<bundles_post_ra>
// kernel: tpu_custom_call.1
= control target key start
LH: loop header
LB: loop body
LE: loop exit
PB: predicated region body
PF: predicated region fallthrough
CT: control target
= control target key end

     0   :  { %12 = vsyncpa [#allocation3], 0  ;;  %s830_s0 = inlined_call_operand.vmem [shape: bf16[2,8,16], index: 0, kind: input, shape index: {}]   ;;  %s831_s1 = inlined_call_operand.vmem [shape: f32[2,8,1], index: 1, kind: input, shape index: {}]   ;;  %s832_s2 = inlined_call_operand.vmem [shape: f32[2,1,4], index: 2, kind: input, shape index: {}]   ;;  %s833_s3 = inlined_call_operand.vmem [shape: bf16[16,32], index: 3, kind: input, shape index: {}]   ;;  %s834_s4 = inlined_call_operand.vmem [shape: f32[1,32], index: 4, kind: input, shape index: {}]   ;;  %s835_s5 = inlined_call_operand.vmem [shape: bf16[32,4], index: 5, kind: input, shape index: {}]   ;;  %s836_s6 = inlined_call_operand.vmem [shape: f32[1,4], index: 6, kind: input, shape index: {}]   ;;  %s837_s7 = inlined_call_operand.hbm [shape: f32[2,2,4], index: 7, kind: output, shape index: {}]  }
   0x1   :  { %14 = vsyncpa [#allocation3 + $0x1], 0  ;;  %s711_s24 = smov 0   ;;  %s713_s25 = smov 0  }
   0x2   :  { %s715_s26 = smov 0   ;;  %s717_s27 = smov 0  }
   0x3 LB: > { %s732_s28 = sadd.s32 4294967295, %s668_s27   ;;  %s530_s29 = sadd.s32 4294967294, %s668_s27   ;;  %s668_s27 = sphi %s717_s27, %s843_s27   ;;  %s664_s26 = sphi %s715_s26, %s842_s26   ;;  %s660_s25 = sphi %s713_s25, %s841_s25   ;;  %s656_s24 = sphi %s711_s24, %s840_s24  }
   0x4   : > { %s736_s30 = sadd.s32 1, %s668_s27   ;;  %s189_s8 = sadd.s32 1, %s664_s26 }
   0x5   : > { %s186_s9 = ssub.s32 %s668_s27, %s736_s30  ;;  %p199_p0 = scmp.ne.s32.totalorder %s664_s26, %s660_s25 }
   0x6   : > { %p187_p1 = scmp.eq.s32.totalorder %s186_s9, 0  ;;  %p200_p2 = scmp.eq.s32.totalorder %s732_s28, 1 }
   0x7   : > { %p205_p3 = scmp.ne.s32.totalorder %s660_s25, %s656_s24  ;;  %p206_p4 = scmp.eq.s32.totalorder %s530_s29, 1 }
   0x8   : > { %s747_s10 = scalar_select %p187_p1, %s664_s26, %s189_s8  }
   0x9   : > { %p749_p5 = por %p200_p2, %p199_p0  ;;  %p753_p6 = por %p206_p4, %p205_p3 }
   0xa   : > { %p533_p7 = scmp.ge.s32.totalorder %s668_s27, 1  ;;  %p256_p8 = scmp.lt.s32.totalorder %s668_s27, 3 }
   0xc   : > { %p257_p9 = pnand %p533_p7, %p256_p8 }
   0xd   : > { %p294_p10 = scmp.lt.s32.totalorder (!%p257_p9), %s732_s28, 1  ;;  %s552_s8 = sshll.u32 (!%p257_p9), %s732_s28, 1 }
   0xe   : > { %260 = sbr.rel (%p257_p9) target bundleno = 338 (0x152), region = 48  ;;  %s445_s14 = scalar_lea.hbm (!%p257_p9), %s837_s7, %s552_s8 }
  0x13   : > { %v555_v0 = vld [vmem:[%s833_s3] sm:$0xff]  ;;  %v670_v1 = vmov 0   ;;  %s764_s15 = scalar_select %p294_p10, %s732_s28, 1  ;;  %vm319_vm0 = vcmask 130048   ;;  %vm351_vm1 = vcmask 7168   ;;  %v557_v11 = vld [vmem:[%s835_s5 + $0x8] sm:$0xff] }
  0x14   : > { %598 = vset.pattern.permute.xlu0 %v670_v1  ;;  %330 = vmatpush.bf16.msra.mxu0 %v555_v0  ;;  %v556_v12 = vld [vmem:[%s835_s5] sm:$0xff]  ;;  %vm343_vm2 = vcmask 261120   ;;  %vm431_vm7 = vcmask 24576  }
  0x15   : > { %s535_s16 = sshll.u32 %s764_s15, 2  ;;  %s536_s17 = sshll.u32 %s764_s15, 3  ;;  %406 = vmatpush.bf16.msra.mxu1 %v557_v11  ;;  %v599_v15 = vld [vmem:[%s834_s4] ss:$0 sm:$0xff] }
  0x16   : > { %s297_s20 = scalar_lea.vmem %s830_s0, %s535_s16  ;;  %s301_s23 = scalar_lea.vmem %s831_s1, %s536_s17  ;;  %v384_v39 = vld [vmem:[%s836_s6] sm:$0x1] }
  0x17   : > { %v306_v2 = vld [vmem:[%s297_s20] sm:$0xf]  ;;  %s291_s17 = sand.u32 1, %s660_s25   ;;  %s304_s29 = scalar_lea.vmem %s832_s2, %s764_s15 }
  0x18   : > { %v336_v3 = vld [vmem:[%s301_s23] sm:$0xff]  ;;  %541 = vmatmul.msk.bf16.vlgmr.msra.gmra.mxu0 %vm319_vm0, %v306_v2  ;;  %s534_s18 = sshll.u32 %s291_s17, 1  ;;  %s449_s15 = sshll.u32 %s445_s14, 4  ;;  %s450_s15 = int_to_ptr.hbm [resolvable:$true] %s449_s15 }
  0x19   : > { %v352_v4 = vsel %vm351_vm1, %v336_v3, 0.0  ;;  %407 = vmatpush.bf16.msra.mxu1 %v556_v12  ;;  %s293_s21 = scalar_lea.vmem [#allocation2], %s534_s18  ;;  %v413_v49 = vld [vmem:[%s304_s29] sm:$0x1]  ;;  %s435_s28 = scalar_lea.sflag [#allocation3], %s291_s17 }
  0x1a   : > { %v353_v5 = vrot.slane %v352_v4, 4  ;;  %s447_s16 = sshll.u32 %s293_s21, 4  ;;  %s620_s18 = sshra.s32 %s450_s15, 4  ;;  %s448_s16 = int_to_ptr.vmem [resolvable:$true] %s447_s16  ;;  %s621_s18 = int_to_ptr.hbm [resolvable:$true] %s620_s18 }
  0x1b   : > { %s622_s19 = scalar_lea.hbm %s621_s18, 2  ;;  %s626_s23 = scalar_lea.hbm %s837_s7, 4 }
  0x1c   : > { %v354_v6 = vadd.f32 %v353_v5, %v352_v4  ;;  %p623_p11 = scmp.ne.s32.totalorder %s621_s18, %s622_s19  ;;  %p627_p0 = scmp.lt.s32.totalorder %s621_s18, %s837_s7 }
  0x1d   : > { %p628_p1 = scmp.lt.s32.totalorder %s626_s23, %s622_s19 }
  0x1e   : > { %v355_v7 = vrot.slane %v354_v6, 2  ;;  %p624_p12 = pnand %p623_p11, %p749_p5 }
  0x1f   : > { %p629_p2 = por %p628_p1, %p627_p0 }
  0x20   : > { %v356_v8 = vadd.f32 %v355_v7, %v354_v6  ;;  %p625_p13 = pneg %p624_p12 }
  0x22   : > { %v357_v9 = vrot.slane %v356_v8, 1  ;;  %p630_p3 = pnand %p629_p2, %p625_p13 }
  0x24   : > { %v358_v10 = vadd.f32 %v357_v9, %v356_v8 }
  0x26   : > { %361 = vperm.xlu0 %598, %v358_v10  }
  0x2e   : > { %339 = vperm.xlu0 %598, %v336_v3  }
  0x95   : > { %v332_v13 = vpop.f32.mrf.mxu0 }
  0x96   : > { %v333_v16 = vadd.f32 %v599_v15, %v332_v13 }
  0x98   : > { %v362_v14 = vpop.permute.xlu0 %361 }
  0x99   : > { %600 = vrcp.f32 %v362_v14  ;;  %v375_v29 = vand.u32 2147483648, %v362_v14  ;;  %vm369_vm4 = vweird.f32 %v362_v14  ;;  %v373_v31 = vand.u32 2147483647, %v362_v14 }
  0x9b   : > { %v376_v34 = vor.u32 1.1754944e-38, %v375_v29  ;;  %vm374_vm6 = vcmp.eq.f32.partialorder %v373_v31, 8.507059e+37 }
  0x9d   : > { %v334_v17 = vpop.f32.mrf.mxu0 }
  0x9f   : > { %v601_v18 = vpop.eup %600 }
  0xa0   : > { %v365_v19 = vmul.f32 %v601_v18, %v362_v14  ;;  %v340_v20 = vpop.permute.xlu0 %339  ;;  %vm370_vm3 = vweird.f32 %v601_v18 }
  0xa1   : > { %v342_v21 = vmul.f32 %v340_v20, %v333_v16  ;;  %vm371_vm5 = vmor %vm369_vm4, %vm370_vm3 }
  0xa2   : > { %v366_v22 = vsub.f32 1.0, %v365_v19 }
  0xa3   : > { %v344_v23 = vsel %vm343_vm2, %v342_v21, 0.0 }
  0xa4   : > { %v367_v24 = vmul.f32 %v601_v18, %v366_v22  ;;  %v345_v25 = vrot.slane %v344_v23, 4 }
  0xa6   : > { %v346_v26 = vadd.f32 %v345_v25, %v344_v23  ;;  %v368_v28 = vadd.f32 %v601_v18, %v367_v24 }
  0xa8   : > { %v347_v27 = vrot.slane %v346_v26, 2  ;;  %v372_v33 = vsel %vm371_vm5, %v601_v18, %v368_v28 }
  0xa9   : > { %v377_v36 = vsel %vm374_vm6, %v376_v34, %v372_v33 }
  0xaa   : > { %v348_v30 = vadd.f32 %v347_v27, %v346_v26 }
  0xac   : > { %v349_v32 = vrot.slane %v348_v30, 1 }
  0xae   : > { %v350_v35 = vadd.f32 %v349_v32, %v348_v30 }
  0xb0   : > { %v378_v37 = vmul.f32 %v377_v36, %v350_v35 }
  0xb2   : > { %v379_v38 = vpack.c.bf16 %v378_v37, %v378_v37 }
  0xb4   : > { %550 = vmatmul.msk.bf16.vlgmr.msra.gmra.mxu1 %vm343_vm2, %v379_v38 }
 0x131   : > { %v409_v40 = vpop.f32.mrf.mxu1 }
 0x132   : > { %v410_v41 = vadd.f32 %v409_v40, %v384_v39 }
 0x134   : > { %v417_v42 = vand.u32 2147483647, %v410_v41  ;;  %432 = vst.msk [vmem:[%s293_s21] sm:$0x1] %vm431_vm7, %v410_v41  ;;  %v414_v51 = vmax.f32 %v410_v41, 0.0  ;;  %v415_v52 = vmul.f32 %v413_v49, %v410_v41 }
 0x136   : > { %v418_v43 = vsub.f32 0.0, %v417_v42  ;;  %v416_v57 = vsub.f32 %v414_v51, %v415_v52 }
 0x138   : > { %v419_v44 = vmul.f32 1.442695, %v418_v43 }
 0x139   : > { %v411_v45 = vpop.f32.mrf.mxu1 }
 0x13a   : > { %602 = vpow2.f32 %v419_v44 }
 0x140   : > { %v603_v46 = vpop.eup %602 }
 0x141   : > { %v421_v47 = vadd.f32 1.0, %v603_v46  ;;  %v424_v48 = vmul.f32 -0.5, %v603_v46  ;;  %v427_v53 = vand.u32 2147483647, %v603_v46 }
 0x143   : > { %604 = vlog2.f32 %v421_v47  ;;  %v425_v50 = vadd.f32 1.0, %v424_v48  ;;  %vm428_vm8 = vcmp.lt.f32.partialorder %v427_v53, 0.0004427343 }
 0x145   : > { %v426_v56 = vmul.f32 %v603_v46, %v425_v50 }
 0x149   : > { %v605_v54 = vpop.eup %604 }
 0x14a   : > { %v423_v55 = vmul.f32 0.6931472, %v605_v54 }
 0x14c   : > { %v429_v58 = vsel %vm428_vm8, %v426_v56, %v423_v55 }
 0x14d   : > { %v430_v59 = vadd.f32 %v429_v58, %v416_v57 }
 0x14f   : > { %433 = vst.msk [vmem:[%s293_s21 + $0x1] sm:$0x1] %vm431_vm7, %v430_v59 }
 0x150   : > { %633 = shalt.err (!%p630_p3)
}
 0x151   : > { %558 = dma.vmem_to_hbm [thread:$0]  (%p749_p5), %s448_s16, 32, %s450_s15, %s435_s28  }
 0x152 PF: > { %p564_p4 = scmp.ge.s32.totalorder %s668_s27, 2  ;;  %s461_s17 = sand.u32 1, %s656_s24  }
 0x153   : > { %s462_s21 = scalar_lea.sflag [#allocation3], %s461_s17 }
 0x154   : > { %p561_p7 = pnand %p564_p4, %p753_p6 }
 0x156   : > { %p562_p8 = pneg %p561_p7 }
 0x158   : > { %651 = dma.done.wait (%p562_p8), %s462_s21, 32  }
 0x159   : > { %653 = vsyncadd (%p562_p8), %s462_s21, 4294967264  ;;  %p17_p9 = scmp.ge.s32.totalorder %s736_s30, 4   ;;  %s840_s24 = smov %s660_s25 }
 0x15a   : > { %s841_s25 = smov %s664_s26  ;;  %s842_s26 = smov %s747_s10 }
 0x15b   : > { %s843_s27 = smov %s736_s30  ;;  %19 = sbr.rel (!%p17_p9) target bundleno = 3 (0x3), region = 89 }
 0x160   :  { %468 = vsyncpa [#allocation3], 1 }
 0x161   :  { %470 = vsyncpa [#allocation3 + $0x1], 1 }

</bundles_post_ra>
